<compile_context>
chip_gen: v7x
topology: tpu7x:2x2x1
jax: 0.10.0
libtpu: 0.0.40
codegen_flags: <defaults>
</compile_context>

<pallas_src>
import functools

import jax
import jax.numpy as jnp
from jax import lax
from jax.experimental import pallas as pl
from jax.experimental.pallas import tpu as pltpu


def _round_up(n: int, m: int) -> int:
    return ((n + m - 1) // m) * m


# --------------------------- pass-1 kernels ---------------------------------


def _gram_stats_kernel(x_ref, colsum_ref, gram_ref):
    """Pass 1 ('gram'): accumulate per-feature column sums of x and G = x^T x."""
    i = pl.program_id(1)                       # reduction axis (batch tiles per core)
    x = x_ref[...]
    csum = jnp.sum(x.astype(jnp.float32), axis=0, keepdims=True)        # (1, Kp)
    g = lax.dot_general(x, x, (((0,), (0,)), ((), ())),                 # x^T @ x
                        preferred_element_type=jnp.float32)
    g = jnp.expand_dims(g, 0)                                           # (1, Kp, Kp)

    @pl.when(i == 0)
    def _():
        colsum_ref[...] = csum
        gram_ref[...] = g

    @pl.when(i != 0)
    def _():
        colsum_ref[...] += csum
        gram_ref[...] += g


def _h_stats_kernel(x_ref, w1_ref, h_ref, sum_ref, sumsq_ref):
    """Pass 1 ('materialize'): h = x @ w1 once; write h; stream sum / sum-of-squares."""
    i = pl.program_id(1)                       # reduction axis (batch tiles per core)
    h = jnp.dot(x_ref[...], w1_ref[...], preferred_element_type=jnp.float32)
    h_ref[...] = h.astype(h_ref.dtype)
    s = jnp.sum(h, axis=0, keepdims=True)
    ss = jnp.sum(h * h, axis=0, keepdims=True)

    @pl.when(i == 0)
    def _():
        sum_ref[...] = s
        sumsq_ref[...] = ss

    @pl.when(i != 0)
    def _():
        sum_ref[...] += s
        sumsq_ref[...] += ss


# --------------------------- pass-2 kernels ---------------------------------


def _fwd_from_x_kernel(x_ref, w1_ref, scale_ref, shift_ref, w2_ref, b2_ref,
                       o_ref, *, mm_dtype, hidden_chunk):
    """Pass 2 ('gram'): h = x@w1 chunked over hidden, fused BN affine + ReLU, matmul2."""
    x = x_ref[...]
    hp = w1_ref.shape[1]
    acc = jnp.zeros(o_ref.shape, jnp.float32)
    for h0 in range(0, hp, hidden_chunk):      # static unrolled chunk loop
        hc = min(hidden_chunk, hp - h0)
        h = jnp.dot(x, w1_ref[:, pl.ds(h0, hc)], preferred_element_type=jnp.float32)
        hr = jnp.maximum(h * scale_ref[:, pl.ds(h0, hc)]
                         + shift_ref[:, pl.ds(h0, hc)], 0.0)
        acc = acc + jnp.dot(hr.astype(mm_dtype), w2_ref[pl.ds(h0, hc), :],
                            preferred_element_type=jnp.float32)
    o_ref[...] = (acc + b2_ref[...]).astype(o_ref.dtype)


def _fwd_from_h_kernel(h_ref, scale_ref, shift_ref, w2_ref, b2_ref, o_ref,
                       *, mm_dtype, hidden_chunk):
    """Pass 2 ('materialize'): read h, fused BN affine + ReLU (chunked), matmul2."""
    hp = h_ref.shape[1]
    acc = jnp.zeros(o_ref.shape, jnp.float32)
    for h0 in range(0, hp, hidden_chunk):      # static unrolled chunk loop
        hc = min(hidden_chunk, hp - h0)
        h = h_ref[:, pl.ds(h0, hc)].astype(jnp.float32)
        hr = jnp.maximum(h * scale_ref[:, pl.ds(h0, hc)]
                         + shift_ref[:, pl.ds(h0, hc)], 0.0)
        acc = acc + jnp.dot(hr.astype(mm_dtype), w2_ref[pl.ds(h0, hc), :],
                            preferred_element_type=jnp.float32)
    o_ref[...] = (acc + b2_ref[...]).astype(o_ref.dtype)


# --------------------------- wrappers ----------------------------------------


def prepare_mlp_params(w1, b1, gamma, beta, w2, b2, *, matmul_dtype=jnp.bfloat16):
    """Pad / cast the fixed MLP parameters once.  Hoist this out of the hot path when
    the same MLP is applied repeatedly (avoids re-writing the weights per call)."""
    del b1  # Exact: training-mode BN subtracts the per-feature batch mean right after
            # l1, which absorbs any constant bias.  Precondition: BN uses batch stats.
    f32 = jnp.float32
    K, H = w1.shape
    O = w2.shape[1]
    Kp, Hp, Op = _round_up(K, 128), _round_up(H, 128), _round_up(O, 128)
    return dict(
        w1=jnp.pad(w1.astype(matmul_dtype), ((0, Kp - K), (0, Hp - H))),
        w2=jnp.pad(w2.astype(matmul_dtype), ((0, Hp - H), (0, Op - O))),
        gamma=jnp.pad(jnp.reshape(gamma, (1, H)).astype(f32), ((0, 0), (0, Hp - H))),
        beta=jnp.pad(jnp.reshape(beta, (1, H)).astype(f32), ((0, 0), (0, Hp - H))),
        b2=jnp.pad(jnp.reshape(b2, (1, O)).astype(f32), ((0, 0), (0, Op - O))),
        dims=(K, H, O), padded=(Kp, Hp, Op), matmul_dtype=matmul_dtype)


def mlp_pallas_prepared(x, params, *, eps=1e-5, batch_tile=512, stats_cores=1,
                        stats_mode="auto", hidden_chunk=None,
                        vmem_cap_bytes=64 * 1024 * 1024, out_dtype=None):
    """Forward pass with pre-padded params (see prepare_mlp_params).

    stats_cores    : 2 on v7x so pass 1 uses both TensorCores (partials reduced here).
    batch_tile     : upper bound on the batch tile; auto-shrunk to fit vmem_cap_bytes.
                     512 is a good default on v5e/v6e; 128-256 on v7x for wide hidden.
    vmem_cap_bytes : 64 MiB default is safe on every generation (v7x physical VMEM);
                     raise to ~112 MiB on v5e/v6e (128 MiB physical) for bigger tiles.
    """
    f32 = jnp.float32
    K, H, O = params["dims"]
    Kp, Hp, Op = params["padded"]
    mm_dtype = params["matmul_dtype"]
    w1_p, w2_p = params["w1"], params["w2"]
    gamma_p, beta_p, b2_p = params["gamma"], params["beta"], params["b2"]

    B = x.shape[0]
    assert x.shape == (B, K)
    out_dtype = out_dtype if out_dtype is not None else x.dtype
    isz = jnp.dtype(mm_dtype).itemsize
    C = max(int(stats_cores), 1)

    # Hidden-dim chunk for pass 2 (caps the live (TB, chunk) f32 intermediate).
    if hidden_chunk is None:
        hidden_chunk = 512
    hidden_chunk = min(_round_up(hidden_chunk, 128), Hp)

    # ---- pass-1 strategy: Gram-matrix stats vs materialized h (roofline-ish). ----
    if stats_mode == "auto":
        flops_per_byte = 300.0   # conservative MXU-flops : HBM-bytes across gens
        gram_cost = (B * Kp * Kp + Kp * Kp * Hp) / flops_per_byte + B * Kp * isz
        mat_cost = 2.0 * B * Hp * isz            # write + re-read h
        stats_mode = "gram" if gram_cost < mat_cost else "materialize"
    assert stats_mode in ("gram", "materialize"), stats_mode

    # ---- batch tile: largest multiple of 8 whose working set fits the VMEM cap. ----
    def _vmem_needed(tb):
        if stats_mode == "gram":
            p1 = (2 * tb * Kp * isz + 3 * Kp * Kp * 4 + 4 * Kp * 4 + tb * Kp * 4)
            p2 = (2 * tb * Kp * isz + Kp * Hp * isz + Hp * Op * isz
                  + 2 * tb * Op * 4 + tb * hidden_chunk * 4 + tb * Op * 4
                  + 4 * Hp * 4 + 2 * Op * 4)
        else:
            p1 = (2 * tb * Kp * isz + Kp * Hp * isz + 2 * tb * Hp * isz
                  + tb * Hp * 4 + 8 * Hp * 4)
            p2 = (2 * tb * Hp * isz + Hp * Op * isz + 2 * tb * Op * 4
                  + tb * hidden_chunk * 4 + tb * Op * 4 + 4 * Hp * 4 + 2 * Op * 4)
        return max(p1, p2)

    TB = _round_up(min(batch_tile, _round_up(B, 8)), 8)
    while TB > 8 and _vmem_needed(TB) > vmem_cap_bytes:
        TB = _round_up(max(8, TB // 2), 8)
    vmem_limit = int(min(vmem_cap_bytes,
                         max(int(_vmem_needed(TB) * 1.25), 16 * 1024 * 1024)))

    nB = pl.cdiv(B, TB)           # batch tiles holding real rows
    nBc = pl.cdiv(nB, C)          # tiles per stats core
    nB_pad = nBc * C
    Bp = nB_pad * TB

    # Single fused cast + pad of the streamed operand (exact: zero rows / zero K cols
    # contribute nothing to the matmuls or the BN sums; extra rows sliced at the end).
    x_p = jnp.pad(x.astype(mm_dtype), ((0, Bp - B), (0, Kp - K)))

    stats_sem = ("parallel", "arbitrary")
    buf1 = pl.Buffered(1)         # residents: no double buffering (VMEM discipline)

    h_p = None
    if stats_mode == "gram":
        colsum_p, gram_p = pl.pallas_call(
            _gram_stats_kernel,
            out_shape=(jax.ShapeDtypeStruct((C, Kp), f32),
                       jax.ShapeDtypeStruct((C, Kp, Kp), f32)),
            grid=(C, nBc),
            in_specs=[pl.BlockSpec((TB, Kp), lambda c, i: (c * nBc + i, 0))],
            out_specs=(pl.BlockSpec((1, Kp), lambda c, i: (c, 0)),
                       pl.BlockSpec((1, Kp, Kp), lambda c, i: (c, 0, 0))),
            compiler_params=pltpu.CompilerParams(
                dimension_semantics=stats_sem, vmem_limit_bytes=vmem_limit),
        )(x_p)
        colsum = jnp.sum(colsum_p, axis=0, keepdims=True)        # (1, Kp)
        gram = jnp.sum(gram_p, axis=0)                           # (Kp, Kp)
        w1_f32 = w1_p.astype(f32)
        # sum_n h = colsum(x) @ w1 ;  sum_n h^2 = diag(w1^T G w1)  (exact algebra).
        mean = jnp.dot(colsum, w1_f32, precision=lax.Precision.HIGHEST) / B
        ex2 = jnp.sum(w1_f32 * jnp.dot(gram, w1_f32, precision=lax.Precision.HIGHEST),
                      axis=0, keepdims=True) / B
    else:
        h_p, sum_p, sumsq_p = pl.pallas_call(
            _h_stats_kernel,
            out_shape=(jax.ShapeDtypeStruct((Bp, Hp), mm_dtype),
                       jax.ShapeDtypeStruct((C, Hp), f32),
                       jax.ShapeDtypeStruct((C, Hp), f32)),
            grid=(C, nBc),
            in_specs=[pl.BlockSpec((TB, Kp), lambda c, i: (c * nBc + i, 0)),
                      pl.BlockSpec((Kp, Hp), lambda c, i: (0, 0),
                                   pipeline_mode=buf1)],
            out_specs=(pl.BlockSpec((TB, Hp), lambda c, i: (c * nBc + i, 0)),
                       pl.BlockSpec((1, Hp), lambda c, i: (c, 0)),
                       pl.BlockSpec((1, Hp), lambda c, i: (c, 0))),
            compiler_params=pltpu.CompilerParams(
                dimension_semantics=stats_sem, vmem_limit_bytes=vmem_limit),
        )(x_p, w1_p)
        mean = jnp.sum(sum_p, axis=0, keepdims=True) / B
        ex2 = jnp.sum(sumsq_p, axis=0, keepdims=True) / B

    # BN scale/shift precomputed once (tiny (1,Hp) ops); pass 2 only applies them.
    # NOTE: E[h^2]-E[h]^2 can cancel when |mean| >> std; clamped at 0.
    var = jnp.maximum(ex2 - mean * mean, 0.0)
    scale = gamma_p * lax.rsqrt(var + eps)                        # (1, Hp) f32
    shift = beta_p - mean * scale                                 # (1, Hp) f32

    resident = lambda i: (0, 0)  # noqa: E731
    if stats_mode == "gram":
        kernel2 = functools.partial(_fwd_from_x_kernel, mm_dtype=mm_dtype,
                                    hidden_chunk=hidden_chunk)
        in_specs2 = [
            pl.BlockSpec((TB, Kp), lambda i: (i, 0)),                    # x streams
            pl.BlockSpec((Kp, Hp), resident, pipeline_mode=buf1),        # w1
            pl.BlockSpec((1, Hp), resident, pipeline_mode=buf1),         # scale
            pl.BlockSpec((1, Hp), resident, pipeline_mode=buf1),         # shift
            pl.BlockSpec((Hp, Op), resident, pipeline_mode=buf1),        # w2
            pl.BlockSpec((1, Op), resident, pipeline_mode=buf1),         # b2
        ]
        args2 = (x_p, w1_p, scale, shift, w2_p, b2_p)
    else:
        kernel2 = functools.partial(_fwd_from_h_kernel, mm_dtype=mm_dtype,
                                    hidden_chunk=hidden_chunk)
        in_specs2 = [
            pl.BlockSpec((TB, Hp), lambda i: (i, 0)),                    # h streams
            pl.BlockSpec((1, Hp), resident, pipeline_mode=buf1),         # scale
            pl.BlockSpec((1, Hp), resident, pipeline_mode=buf1),         # shift
            pl.BlockSpec((Hp, Op), resident, pipeline_mode=buf1),        # w2
            pl.BlockSpec((1, Op), resident, pipeline_mode=buf1),         # b2
        ]
        args2 = (h_p, scale, shift, w2_p, b2_p)

    out_p = pl.pallas_call(
        kernel2,
        out_shape=jax.ShapeDtypeStruct((Bp, Op), out_dtype),
        grid=(nB_pad,),
        in_specs=in_specs2,
        out_specs=pl.BlockSpec((TB, Op), lambda i: (i, 0)),              # lane-dense
        compiler_params=pltpu.CompilerParams(
            dimension_semantics=("parallel",), vmem_limit_bytes=vmem_limit),
    )(*args2)
    return out_p[:B, :O]


def mlp_pallas(x, w1, b1, gamma, beta, w2, b2, *, eps=1e-5,
               matmul_dtype=jnp.bfloat16, **kwargs):
    """Convenience wrapper: prepare params then run.  For repeated application with
    fixed weights, call prepare_mlp_params once and mlp_pallas_prepared per batch."""
    params = prepare_mlp_params(w1, b1, gamma, beta, w2, b2, matmul_dtype=matmul_dtype)
    return mlp_pallas_prepared(x, params, eps=eps, **kwargs)


# --------------------------- reference / tests -------------------------------


def mlp_ref(x, w1, b1, gamma, beta, w2, b2, eps=1e-5):
    """Pure-JAX reference matching the PyTorch MLP in training mode."""
    h = x @ w1 + b1
    mean = jnp.mean(h, axis=0, keepdims=True)
    var = jnp.mean((h - mean) ** 2, axis=0, keepdims=True)
    hn = (h - mean) * lax.rsqrt(var + eps) * gamma + beta
    hr = jnp.maximum(hn, 0.0)
    return hr @ w2 + b2


def _make_params(key, B, input_dim, hidden_dim, output_dim):
    kx, k1, kb1, kg, kb, k2, kb2 = jax.random.split(key, 7)
    x = jax.random.normal(kx, (B, input_dim), dtype=jnp.float32)
    bound1 = 1.0 / jnp.sqrt(jnp.float32(input_dim))
    w1 = jax.random.uniform(k1, (input_dim, hidden_dim), jnp.float32, -bound1, bound1)
    b1 = jax.random.uniform(kb1, (1, hidden_dim), jnp.float32, -bound1, bound1)
    gamma = 1.0 + 0.1 * jax.random.normal(kg, (1, hidden_dim), jnp.float32)
    beta = 0.1 * jax.random.normal(kb, (1, hidden_dim), jnp.float32)
    bound2 = 1.0 / jnp.sqrt(jnp.float32(hidden_dim))
    w2 = jax.random.uniform(k2, (hidden_dim, output_dim), jnp.float32, -bound2, bound2)
    b2 = jax.random.uniform(kb2, (1, output_dim), jnp.float32, -bound2, bound2)
    return x, w1, b1, gamma, beta, w2, b2


if __name__ == "__main__":
    # --- Test 1: materialized-h stats path, single tile, f32 (tight check). ---
    B, K, H, O = 8, 32, 64, 32
    p1 = _make_params(jax.random.PRNGKey(0), B, K, H, O)
    ref1 = mlp_ref(*p1)
    out1 = jax.block_until_ready(
        mlp_pallas(*p1, matmul_dtype=jnp.float32, stats_mode="materialize"))
    assert out1.shape == (B, O)
    assert jnp.allclose(out1, ref1, atol=1e-4, rtol=1e-4), "materialize/f32 mismatch"

    # --- Test 2: Gram-stats path, multi-tile, 2-way stats split, batch padding. ---
    B2 = 20
    p2 = _make_params(jax.random.PRNGKey(1), B2, K, H, O)
    ref2 = mlp_ref(*p2)
    out2 = jax.block_until_ready(
        mlp_pallas(*p2, matmul_dtype=jnp.float32, stats_mode="gram",
                   batch_tile=8, stats_cores=2))
    assert out2.shape == (B2, O)
    assert jnp.allclose(out2, ref2, atol=1e-4, rtol=1e-4), "gram/f32 mismatch"

    # --- Test 3: default bf16 path ("auto"), ragged dims + hidden chunking (loose). ---
    B3, K3, H3, O3 = 24, 48, 320, 40
    p3 = _make_params(jax.random.PRNGKey(2), B3, K3, H3, O3)
    ref3 = mlp_ref(*p3)
    out3 = jax.block_until_ready(mlp_pallas(*p3, hidden_chunk=128, batch_tile=16))
    assert out3.shape == (B3, O3)
    assert jnp.allclose(out3, ref3, atol=1e-1, rtol=1e-1), "bf16 mismatch"

    # --- Test 4: chunked hidden dim + materialized h + 2-way stats split in f32. ---
    out4 = jax.block_until_ready(
        mlp_pallas(*p3, matmul_dtype=jnp.float32, hidden_chunk=128,
                   stats_mode="materialize", stats_cores=2, batch_tile=16))
    assert jnp.allclose(out4, ref3, atol=1e-4, rtol=1e-4), "chunked/f32 mismatch"

    print("KERNEL_OK")
</pallas_src>

<mosaic_0001>
module attributes {stable_mosaic.version = 11 : i64} {
  func.func @_h_stats_kernel(%arg0: i32, %arg1: i32, %arg2: memref<8x128xf32, #tpu.memory_space<vmem>>, %arg3: memref<128x128xf32, #tpu.memory_space<vmem>>, %arg4: memref<8x128xf32, #tpu.memory_space<vmem>>, %arg5: memref<1x128xf32, #tpu.memory_space<vmem>>, %arg6: memref<1x128xf32, #tpu.memory_space<vmem>>) attributes {dimension_semantics = [#tpu.dimension_semantics<parallel>, #tpu.dimension_semantics<arbitrary>], iteration_bounds = array<i64: 1, 1>, scalar_prefetch = 0 : i64, scratch_operands = 0 : i64, tpu.core_type = #tpu.core_type<tc>, window_params = [{transform_indices = @transform_0, window_bounds = array<i64: 8, 128>}, {pipeline_mode = #tpu.pipeline_mode<synchronous>, transform_indices = @transform_1, window_bounds = array<i64: 128, 128>}, {transform_indices = @transform_2, window_bounds = array<i64: 8, 128>}, {transform_indices = @transform_3, window_bounds = array<i64: 1, 128>}, {transform_indices = @transform_4, window_bounds = array<i64: 1, 128>}]} {
    %c0 = arith.constant 0 : index
    %c0_0 = arith.constant 0 : index
    %0 = vector.load %arg2[%c0, %c0_0] : memref<8x128xf32, #tpu.memory_space<vmem>>, vector<8x128xf32>
    %c0_1 = arith.constant 0 : index
    %c0_2 = arith.constant 0 : index
    %1 = vector.load %arg3[%c0_1, %c0_2] : memref<128x128xf32, #tpu.memory_space<vmem>>, vector<128x128xf32>
    %cst = arith.constant dense<0.000000e+00> : vector<8x128xf32>
    %2 = tpu.matmul %0, %1, %cst {dimension_numbers = #tpu.dot_dimension_numbers<[1], [0], [0], [1], [0, 0, 1, 1], [], []>} : vector<8x128xf32>, vector<128x128xf32>, vector<8x128xf32> -> vector<8x128xf32>
    %c0_3 = arith.constant 0 : index
    %c0_4 = arith.constant 0 : index
    %3 = vector.load %arg4[%c0_3, %c0_4] : memref<8x128xf32, #tpu.memory_space<vmem>>, vector<8x128xf32>
    tpu.vector_store %arg4[%c0_3, %c0_4], %2 {strides = array<i32>} : memref<8x128xf32, #tpu.memory_space<vmem>>, vector<8x128xf32>,
    %cst_5 = arith.constant dense<0.000000e+00> : vector<128xf32>
    %4 = vector.multi_reduction <add>, %2, %cst_5 [0] : vector<8x128xf32> to vector<128xf32>
    %5 = vector.shape_cast %4 : vector<128xf32> to vector<1x128xf32>
    %6 = arith.mulf %2, %2 : vector<8x128xf32>
    %cst_6 = arith.constant dense<0.000000e+00> : vector<128xf32>
    %7 = vector.multi_reduction <add>, %6, %cst_6 [0] : vector<8x128xf32> to vector<128xf32>
    %8 = vector.shape_cast %7 : vector<128xf32> to vector<1x128xf32>
    %c0_i32 = arith.constant 0 : i32
    %9 = arith.cmpi eq, %arg1, %c0_i32 : i32
    %10 = arith.extui %9 : i1 to i32
    %c0_i32_7 = arith.constant 0 : i32
    %11 = arith.cmpi ne, %10, %c0_i32_7 : i32
    scf.if %11 {
      %c0_10 = arith.constant 0 : index
      %c0_11 = arith.constant 0 : index
      %15 = vector.load %arg5[%c0_10, %c0_11] : memref<1x128xf32, #tpu.memory_space<vmem>>, vector<1x128xf32>
      tpu.vector_store %arg5[%c0_10, %c0_11], %5 {strides = array<i32>} : memref<1x128xf32, #tpu.memory_space<vmem>>, vector<1x128xf32>,
      %c0_12 = arith.constant 0 : index
      %c0_13 = arith.constant 0 : index
      %16 = vector.load %arg6[%c0_12, %c0_13] : memref<1x128xf32, #tpu.memory_space<vmem>>, vector<1x128xf32>
      tpu.vector_store %arg6[%c0_12, %c0_13], %8 {strides = array<i32>} : memref<1x128xf32, #tpu.memory_space<vmem>>, vector<1x128xf32>,
    } else {
    }
    %c0_i32_8 = arith.constant 0 : i32
    %12 = arith.cmpi ne, %arg1, %c0_i32_8 : i32
    %13 = arith.extui %12 : i1 to i32
    %c0_i32_9 = arith.constant 0 : i32
    %14 = arith.cmpi ne, %13, %c0_i32_9 : i32
    scf.if %14 {
      %c0_10 = arith.constant 0 : index
      %c0_11 = arith.constant 0 : index
      %15 = vector.load %arg5[%c0_10, %c0_11] : memref<1x128xf32, #tpu.memory_space<vmem>>, vector<1x128xf32>
      %16 = arith.addf %15, %5 : vector<1x128xf32>
      %c0_12 = arith.constant 0 : index
      %c0_13 = arith.constant 0 : index
      %17 = vector.load %arg5[%c0_12, %c0_13] : memref<1x128xf32, #tpu.memory_space<vmem>>, vector<1x128xf32>
      tpu.vector_store %arg5[%c0_12, %c0_13], %16 {strides = array<i32>} : memref<1x128xf32, #tpu.memory_space<vmem>>, vector<1x128xf32>,
      %c0_14 = arith.constant 0 : index
      %c0_15 = arith.constant 0 : index
      %18 = vector.load %arg6[%c0_14, %c0_15] : memref<1x128xf32, #tpu.memory_space<vmem>>, vector<1x128xf32>
      %19 = arith.addf %18, %8 : vector<1x128xf32>
      %c0_16 = arith.constant 0 : index
      %c0_17 = arith.constant 0 : index
      %20 = vector.load %arg6[%c0_16, %c0_17] : memref<1x128xf32, #tpu.memory_space<vmem>>, vector<1x128xf32>
      tpu.vector_store %arg6[%c0_16, %c0_17], %19 {strides = array<i32>} : memref<1x128xf32, #tpu.memory_space<vmem>>, vector<1x128xf32>,
    } else {
    }
    return
  }
  func.func @transform_0(%arg0: i32, %arg1: i32) -> (i32, i32) {
    %c1_i32 = arith.constant 1 : i32
    %0 = arith.muli %arg0, %c1_i32 : i32
    %1 = arith.addi %0, %arg1 : i32
    %c0_i32 = arith.constant 0 : i32
    %c0_i32_0 = arith.constant 0 : i32
    return %1, %c0_i32 : i32, i32
  }
  func.func @transform_1(%arg0: i32, %arg1: i32) -> (i32, i32) {
    %c0_i32 = arith.constant 0 : i32
    %c0_i32_0 = arith.constant 0 : i32
    %c0_i32_1 = arith.constant 0 : i32
    return %c0_i32, %c0_i32_0 : i32, i32
  }
  func.func @transform_2(%arg0: i32, %arg1: i32) -> (i32, i32) {
    %c1_i32 = arith.constant 1 : i32
    %0 = arith.muli %arg0, %c1_i32 : i32
    %1 = arith.addi %0, %arg1 : i32
    %c0_i32 = arith.constant 0 : i32
    %c0_i32_0 = arith.constant 0 : i32
    return %1, %c0_i32 : i32, i32
  }
  func.func @transform_3(%arg0: i32, %arg1: i32) -> (i32, i32) {
    %c0_i32 = arith.constant 0 : i32
    %c0_i32_0 = arith.constant 0 : i32
    return %arg0, %c0_i32 : i32, i32
  }
  func.func @transform_4(%arg0: i32, %arg1: i32) -> (i32, i32) {
    %c0_i32 = arith.constant 0 : i32
    %c0_i32_0 = arith.constant 0 : i32
    return %arg0, %c0_i32 : i32, i32
  }
}

</mosaic_0001>

<bundles_post_ra>
// kernel: tpu_custom_call.1
= control target key start
LH: loop header
LB: loop body
LE: loop exit
PB: predicated region body
PF: predicated region fallthrough
CT: control target
= control target key end

     0   :  { %10 = vsyncpa [#allocation3], 0  ;;  %s524_s0 = inlined_call_operand.hbm [shape: f32[8,128], index: 0, kind: input, shape index: {}]   ;;  %s525_s1 = inlined_call_operand.hbm [shape: f32[128,128], index: 1, kind: input, shape index: {}]   ;;  %s526_s2 = inlined_call_operand.hbm [shape: f32[8,128], index: 2, kind: output, shape index: {0}]   ;;  %s527_s3 = inlined_call_operand.hbm [shape: f32[1,128], index: 3, kind: output, shape index: {1}]   ;;  %s528_s4 = inlined_call_operand.hbm [shape: f32[1,128], index: 4, kind: output, shape index: {2}]  }
   0x1   :  { %11 = vsyncpa [#allocation6], 0 }
   0x2   :  { %12 = vsyncpa [#allocation4], 0 }
   0x3   :  { %13 = vsyncpa [#allocation9], 0  ;;  %s414_s15 = smov [#allocation2]   ;;  %s415_s17 = smov [#allocation5]  }
   0x4   :  { %s23_s16 = sshll.u32 %s414_s15, 4  ;;  %s32_s18 = sshll.u32 %s415_s17, 4  ;;  %s24_s16 = int_to_ptr.vmem [resolvable:$true] %s23_s16  ;;  %s449_s18 = int_to_ptr.vmem [resolvable:$true] %s32_s18 }
   0x5   :  { %s296_s21 = scalar_lea.hbm %s524_s0, 128 }
   0x6   :  { %p297_p0 = scmp.ne.s32.totalorder %s524_s0, %s296_s21  ;;  %p300_p1 = scmp.lt.u32.totalorder %s296_s21, %s524_s0 }
   0x8   :  { %p302_p2 = pnand %p300_p1, %p297_p0 }
   0xa   :  { %305 = shalt.err (!%p302_p2)
}
   0xb   :  { %s306_s26 = scalar_lea.vmem %s24_s16, 128  ;;  %p311_p4 = scmp.lt.s32.totalorder %s24_s16, %s24_s16 }
   0xc   :  { %p307_p3 = scmp.ne.s32.totalorder %s24_s16, %s306_s26  ;;  %p312_p5 = scmp.lt.s32.totalorder %s306_s26, %s306_s26 }
   0xe   :  { %p313_p6 = por %p312_p5, %p311_p4 }
  0x10   :  { %p314_p7 = pnand %p313_p6, %p307_p3 }
  0x12   :  { %317 = shalt.err (!%p314_p7)
}
  0x13   :  { %26 = dma.hbm_to_vmem [thread:$0]  %s524_s0, 128, %s24_s16, [#allocation3]  }
  0x14   :  { %s318_s5 = scalar_lea.hbm %s525_s1, 2048 }
  0x15   :  { %p319_p8 = scmp.ne.s32.totalorder %s525_s1, %s318_s5  ;;  %p322_p9 = scmp.lt.u32.totalorder %s318_s5, %s525_s1 }
  0x17   :  { %p324_p10 = pnand %p322_p9, %p319_p8 }
  0x19   :  { %327 = shalt.err (!%p324_p10)
}
  0x1a   :  { %s328_s10 = scalar_lea.vmem %s449_s18, 2048  ;;  %p333_p12 = scmp.lt.s32.totalorder %s449_s18, %s449_s18 }
  0x1b   :  { %p329_p11 = scmp.ne.s32.totalorder %s449_s18, %s328_s10  ;;  %p334_p13 = scmp.lt.s32.totalorder %s328_s10, %s328_s10 }
  0x1d   :  { %p335_p0 = por %p334_p13, %p333_p12 }
  0x1f   :  { %p336_p1 = pnand %p335_p0, %p329_p11 }
  0x21   :  { %339 = shalt.err (!%p336_p1)
}
  0x22   :  { %s416_s0 = smov 128   ;;  %s417_s11 = smov 8  }
  0x23   :  { %38 = dma.hbm_to_vmem [thread:$0]  %s525_s1, 2048, %s449_s18, [#allocation6], %s416_s0, %s416_s0, %s417_s11  }
  0x24   :  { %406 = dma.done.wait [#allocation3], 128  }
  0x25   :  { %407 = vsyncadd [#allocation3], 4294967168 }
  0x26   :  { %408 = dma.done.wait [#allocation6], 2048  }
  0x27   :  { %409 = vsyncadd [#allocation6], 4294965248  ;;  %v418_v0 = vmov 0.0|0.0   ;;  %vm419_vm0 = vmmov 0   ;;  %v420_v1 = vmov 0.0   ;;  %v48_v2 = vld [vmem:[#allocation5] sm:$0xff] }
  0x28   :  { %262 = vmatprep.subr.bf16.mxu0 %v418_v0  ;;  %259 = vmatprep.mubr.msk.f32.mxu0 %vm419_vm0, %v420_v1  ;;  %v49_v3 = vld [vmem:[#allocation5 + $0x8] sm:$0xff]  ;;  %v50_v4 = vld [vmem:[#allocation5 + $0x10] sm:$0xff]  ;;  %v51_v6 = vld [vmem:[#allocation5 + $0x18] sm:$0xff]  ;;  %s421_s1 = smov [#allocation7]  }
  0x29   :  { %v263_v5 = vpack.c.bf16 %v49_v3, %v48_v2  ;;  %v266_v7 = vpack.c.bf16 %v51_v6, %v50_v4  ;;  %v52_v8 = vld [vmem:[#allocation5 + $0x20] sm:$0xff]  ;;  %v53_v9 = vld [vmem:[#allocation5 + $0x28] sm:$0xff]  ;;  %v54_v11 = vld [vmem:[#allocation5 + $0x30] sm:$0xff]  ;;  %s173_s14 = sshll.u32 %s421_s1, 4  ;;  %s174_s14 = int_to_ptr.vmem [resolvable:$true] %s173_s14 }
  0x2a   :  { %v269_v10 = vpack.c.bf16 %v53_v9, %v52_v8  ;;  %v55_v12 = vld [vmem:[#allocation5 + $0x38] sm:$0xff]  ;;  %v56_v14 = vld [vmem:[#allocation5 + $0x40] sm:$0xff]  ;;  %v57_v15 = vld [vmem:[#allocation5 + $0x48] sm:$0xff]  ;;  %s340_s15 = scalar_lea.vmem %s174_s14, 128  ;;  %p345_p3 = scmp.lt.s32.totalorder %s174_s14, %s174_s14 }
  0x2b   :  { %264 = vmatpush3.bf16.msra.mxu0 %v263_v5  ;;  %v272_v13 = vpack.c.bf16 %v55_v12, %v54_v11  ;;  %v275_v16 = vpack.c.bf16 %v57_v15, %v56_v14  ;;  %v58_v17 = vld [vmem:[#allocation5 + $0x50] sm:$0xff]  ;;  %v59_v18 = vld [vmem:[#allocation5 + $0x58] sm:$0xff]  ;;  %v60_v20 = vld [vmem:[#allocation5 + $0x60] sm:$0xff]  ;;  %p341_p2 = scmp.ne.s32.totalorder %s174_s14, %s340_s15  ;;  %p346_p4 = scmp.lt.s32.totalorder %s340_s15, %s340_s15 }
  0x2c   :  { %265 = vmatprep.subr.bf16.mxu0 %v418_v0  ;;  %v278_v19 = vpack.c.bf16 %v59_v18, %v58_v17  ;;  %v61_v21 = vld [vmem:[#allocation5 + $0x68] sm:$0xff]  ;;  %v62_v23 = vld [vmem:[#allocation5 + $0x70] sm:$0xff]  ;;  %v63_v24 = vld [vmem:[#allocation5 + $0x78] sm:$0xff] }
  0x2d   :  { %v281_v22 = vpack.c.bf16 %v61_v21, %v60_v20  ;;  %v284_v25 = vpack.c.bf16 %v63_v24, %v62_v23  ;;  %v47_v26 = vld [vmem:[#allocation2] sm:$0xff]  ;;  %p347_p5 = por %p346_p4, %p345_p3 }
  0x2f   :  { %267 = vmatpush3.bf16.msra.mxu0 %v266_v7  ;;  %p348_p6 = pnand %p347_p5, %p341_p2 }
  0x30   :  { %268 = vmatprep.subr.bf16.mxu0 %v418_v0 }
  0x33   :  { %270 = vmatpush3.bf16.msra.mxu0 %v269_v10 }
  0x34   :  { %271 = vmatprep.subr.bf16.mxu0 %v418_v0 }
  0x37   :  { %273 = vmatpush3.bf16.msra.mxu0 %v272_v13 }
  0x38   :  { %274 = vmatprep.subr.bf16.mxu0 %v418_v0 }
  0x3b   :  { %276 = vmatpush3.bf16.msra.mxu0 %v275_v16 }
  0x3c   :  { %277 = vmatprep.subr.bf16.mxu0 %v418_v0 }
  0x3f   :  { %279 = vmatpush3.bf16.msra.mxu0 %v278_v19 }
  0x40   :  { %280 = vmatprep.subr.bf16.mxu0 %v418_v0 }
  0x43   :  { %282 = vmatpush3.bf16.msra.mxu0 %v281_v22 }
  0x44   :  { %283 = vmatprep.subr.bf16.mxu0 %v418_v0 }
  0x47   :  { %285 = vmatpush3.bf16.msra.mxu0 %v284_v25 }
  0x4a   :  { %260 = vmatmul.mubr.f32.vlgmr.msra.gmra.mrb[0].mxu0 %v47_v26 }
 0x11d   :  { %v130_v27 = vpop.f32.mrb[0].mxu0 }
 0x11e   :  { %v135_v28 = vrot.slane %v130_v27, 4  ;;  %v141_v29 = vmul.f32 %v130_v27, %v130_v27  ;;  %134 = vst [vmem:[#allocation7] sm:$0xff] %v130_v27  ;;  %v261_v30 = vpop.f32.mrb[1].mxu0 }
 0x11f   :  { %351 = shalt.err (!%p348_p6)
}
 0x120   :  { %s352_s18 = scalar_lea.hbm %s526_s2, 128 }
 0x121   :  { %p353_p7 = scmp.ne.s32.totalorder %s526_s2, %s352_s18  ;;  %p356_p8 = scmp.lt.u32.totalorder %s352_s18, %s526_s2 }
 0x123   :  { %p358_p9 = pnand %p356_p8, %p353_p7 }
 0x125   :  { %361 = shalt.err (!%p358_p9)
}
 0x126   :  { %176 = dma.vmem_to_hbm [thread:$0]  %s174_s14, 128, %s526_s2, [#allocation4]   ;;  %v136_v31 = vadd.f32 %v135_v28, %v130_v27  ;;  %v142_v32 = vrot.slane %v141_v29, 4 }
 0x127   :  { %s422_s25 = smov [#allocation8]   ;;  %s423_s27 = smov [#allocation10]  }
 0x128   :  { %v143_v33 = vadd.f32 %v142_v32, %v141_v29  ;;  %v137_v34 = vrot.slane %v136_v31, 2  ;;  %s183_s26 = sshll.u32 %s422_s25, 4  ;;  %s193_s28 = sshll.u32 %s423_s27, 4  ;;  %s184_s26 = int_to_ptr.vmem [resolvable:$true] %s183_s26  ;;  %s492_s28 = int_to_ptr.vmem [resolvable:$true] %s193_s28 }
 0x129   :  { %s362_s2 = scalar_lea.vmem %s184_s26, 16  ;;  %s366_s29 = scalar_lea.vmem %s184_s26, 32 }
 0x12a   :  { %v138_v35 = vadd.f32 %v137_v34, %v136_v31  ;;  %v144_v36 = vrot.slane %v143_v33, 2  ;;  %p363_p10 = scmp.ne.s32.totalorder %s184_s26, %s362_s2  ;;  %p367_p11 = scmp.lt.s32.totalorder %s184_s26, %s184_s26 }
 0x12b   :  { %p368_p12 = scmp.lt.s32.totalorder %s366_s29, %s362_s2 }
 0x12c   :  { %v139_v37 = vrot.slane %v138_v35, 1  ;;  %v145_v38 = vadd.f32 %v144_v36, %v143_v33 }
 0x12d   :  { %p369_p13 = por %p368_p12, %p367_p11 }
 0x12e   :  { %v140_v39 = vadd.f32 %v139_v37, %v138_v35  ;;  %v146_v40 = vrot.slane %v145_v38, 1 }
 0x12f   :  { %p370_p0 = pnand %p369_p13, %p363_p10 }
 0x130   :  { %152 = vst [vmem:[#allocation8] sm:$0x1] %v140_v39  ;;  %v147_v41 = vadd.f32 %v146_v40, %v145_v38 }
 0x131   :  { %373 = shalt.err (!%p370_p0)
}
 0x132   :  { %s374_s6 = scalar_lea.hbm %s527_s3, 16 }
 0x133   :  { %p375_p1 = scmp.ne.s32.totalorder %s527_s3, %s374_s6  ;;  %p378_p2 = scmp.lt.u32.totalorder %s374_s6, %s527_s3 }
 0x135   :  { %p380_p3 = pnand %p378_p2, %p375_p1 }
 0x137   :  { %383 = shalt.err (!%p380_p3)
}
 0x138   :  { %186 = dma.vmem_to_hbm [thread:$0]  %s184_s26, 16, %s527_s3, [#allocation9]   ;;  %153 = vst [vmem:[#allocation10] sm:$0x1] %v147_v41 }
 0x139   :  { %s384_s12 = scalar_lea.vmem %s492_s28, 16  ;;  %s388_s13 = scalar_lea.vmem %s492_s28, 32 }
 0x13a   :  { %p385_p4 = scmp.ne.s32.totalorder %s492_s28, %s384_s12  ;;  %p389_p5 = scmp.lt.s32.totalorder %s492_s28, %s492_s28 }
 0x13b   :  { %p390_p6 = scmp.lt.s32.totalorder %s388_s13, %s384_s12 }
 0x13d   :  { %p391_p7 = por %p390_p6, %p389_p5 }
 0x13f   :  { %p392_p8 = pnand %p391_p7, %p385_p4 }
 0x141   :  { %395 = shalt.err (!%p392_p8)
}
 0x142   :  { %s396_s15 = scalar_lea.hbm %s528_s4, 16 }
 0x143   :  { %p397_p9 = scmp.ne.s32.totalorder %s528_s4, %s396_s15  ;;  %p400_p10 = scmp.lt.u32.totalorder %s396_s15, %s528_s4 }
 0x145   :  { %p402_p11 = pnand %p400_p10, %p397_p9 }
 0x147   :  { %405 = shalt.err (!%p402_p11)
}
 0x148   :  { %196 = dma.vmem_to_hbm [thread:$0]  %s492_s28, 16, %s528_s4, [#allocation9]  }
 0x149   :  { %410 = dma.done.wait [#allocation4], 128  }
 0x14a   :  { %411 = vsyncadd [#allocation4], 4294967168 }
 0x14b   :  { %412 = dma.done.wait [#allocation9], 32  }
 0x14c   :  { %413 = vsyncadd [#allocation9], 4294967264 }
 0x14d   :  { %206 = vsyncpa [#allocation3], 1 }
 0x14e   :  { %207 = vsyncpa [#allocation6], 1 }
 0x14f   :  { %208 = vsyncpa [#allocation4], 1 }
 0x150   :  { %209 = vsyncpa [#allocation9], 1 }

</bundles_post_ra>
